<compile_context>
chip_gen: v6e
topology: v6e:2x2x1
jax: 0.10.0
libtpu: 0.0.40
codegen_flags: <defaults>
</compile_context>

<pallas_src>
import functools

import jax
import jax.numpy as jnp
from jax.experimental import pallas as pl
from jax.experimental.pallas import tpu as pltpu


# ---------------------------------------------------------------------------
# Kernel
# ---------------------------------------------------------------------------
def _approx_net_kernel(x_ref, weff_ref, aux_ref, bL2_ref, o_ref):
    # x_ref:   (TB, N)    batch tile, batch on sublanes, features on lanes
    # weff:    (L, N+1)   folded conv1+conv2+linear_1 weight (min column appended)
    # aux:     (L, 2)     [:,0] folded bias (beff), [:,1] linear_2 weight column
    # bL2:     (1, 1)     linear_2 bias (SMEM scalar)
    # o_ref:   (1, TB)    lane-dense output row for this tile
    x = x_ref[...]                                              # (TB, N)
    minv = jnp.min(x, axis=1, keepdims=True)                    # (TB, 1) lane reduce
    x_aug = jnp.concatenate([x, minv], axis=1)                  # (TB, N+1)

    # Contract the feature axis of BOTH operands -> (L, TB); batch lands on lanes and
    # no explicit transpose of the x tile is materialized.
    hT = jax.lax.dot_general(
        weff_ref[...], x_aug,
        dimension_numbers=(((1,), (1,)), ((), ())),
        preferred_element_type=jnp.float32)                     # (L, TB)

    hT = hT + aux_ref[:, 0:1]                                   # folded bias
    hT = jnp.maximum(hT, 0.01 * hT)                             # LeakyReLU(0.01)

    # linear_2 (L -> 1) as VPU multiply + sublane reduce (avoids a width-1 MXU matmul)
    yT = jnp.sum(hT * aux_ref[:, 1:2], axis=0, keepdims=True) + bL2_ref[0, 0]  # (1, TB)
    o_ref[...] = jnp.maximum(yT, 0.0)                           # ReLU


# ---------------------------------------------------------------------------
# Parameter folding (do this ONCE per parameter set; it is pure JAX prep work)
# ---------------------------------------------------------------------------
def fold_params(params, n_features):
    conv1_w, conv1_b = params["conv1_w"], params["conv1_b"]      # (C1,1,1), (C1,)
    conv2_w, conv2_b = params["conv2_w"], params["conv2_b"]      # (C2,C1,1), (C2,)
    l1_w, l1_b = params["linear1_w"], params["linear1_b"]        # (L, C2*N+1), (L,)
    l2_w, l2_b = params["linear2_w"], params["linear2_b"]        # (1, L), (1,)

    N = n_features
    C1 = conv1_w.shape[0]
    C2 = conv2_w.shape[0]
    L = l1_w.shape[0]

    w1 = conv1_w.reshape(C1)                                     # (C1,)
    w2 = conv2_w.reshape(C2, C1)                                 # (C2, C1)
    s = w2 @ w1                                                  # (C2,)
    t = w2 @ conv1_b + conv2_b                                   # (C2,)
    # torch .view(B, -1) on (B, C2, N) flattens c2-major with n fastest:
    W1r = l1_w[:, : C2 * N].reshape(L, C2, N)                    # (L, C2, N)
    weff = jnp.einsum("c,lcn->ln", s, W1r)                       # (L, N)
    beff = l1_b + jnp.einsum("c,lcn->l", t, W1r)                 # (L,)
    w1min = l1_w[:, C2 * N].reshape(L, 1)                        # (L, 1)

    weff_aug = jnp.concatenate([weff, w1min], axis=1)            # (L, N+1)
    aux = jnp.concatenate([beff.reshape(L, 1), l2_w.reshape(L, 1)], axis=1)  # (L, 2)
    bL2 = l2_b.reshape(1, 1)                                     # (1, 1) SMEM scalar
    return weff_aug, aux, bL2


def _round_up(v, m):
    return ((v + m - 1) // m) * m


# ---------------------------------------------------------------------------
# Wrapper
# ---------------------------------------------------------------------------
@functools.partial(jax.jit, static_argnames=("max_tile_b",))
def _call_kernel(x, weff_aug, aux, bL2, *, max_tile_b=4096):
    B, N = x.shape
    L = weff_aug.shape[0]

    # Batch tiling: big lane-dense tiles (grid-step overhead bound), but cap so the
    # grid has >= 2 steps when possible -> both v7x TensorCores get work.
    MIN_TILE = 128
    if B <= MIN_TILE:
        tb = MIN_TILE                                   # single 128-aligned tile
    else:
        half = _round_up(pl.cdiv(B, 2), MIN_TILE)
        tb = min(max_tile_b, half)
    b_pad = _round_up(B, tb)
    if b_pad != B:
        x = jnp.pad(x, ((0, b_pad - B), (0, 0)))        # padded rows sliced off below
    grid = (b_pad // tb,)

    out = pl.pallas_call(
        _approx_net_kernel,
        out_shape=jax.ShapeDtypeStruct((1, b_pad), jnp.float32),
        grid=grid,
        in_specs=[
            pl.BlockSpec((tb, N), lambda i: (i, 0)),     # x: streamed per batch tile
            pl.BlockSpec((L, N + 1), lambda i: (0, 0)),  # folded weight: VMEM-resident
            pl.BlockSpec((L, 2), lambda i: (0, 0)),      # [beff | w2] slab
            pl.BlockSpec(memory_space=pltpu.MemorySpace.SMEM),   # bL2 scalar
        ],
        out_specs=pl.BlockSpec((1, tb), lambda i: (0, i)),       # contiguous row store
        compiler_params=pltpu.CompilerParams(
            dimension_semantics=("parallel",)),          # v7x: split B over 2 TCs
    )(x, weff_aug, aux, bL2)

    return out[0, :B].reshape(B, 1)                      # (B, 1)


def approx_net_intensity_pallas(x, params, *, max_tile_b=4096):
    """x: (B, N) float32. params: dict of PyTorch-shaped parameters."""
    weff_aug, aux, bL2 = fold_params(params, x.shape[1])
    return _call_kernel(x, weff_aug, aux, bL2, max_tile_b=max_tile_b)


# ---------------------------------------------------------------------------
# Pure-JAX reference (mirrors the PyTorch forward, for correctness checking)
# ---------------------------------------------------------------------------
def reference_forward(x, params):
    conv1_w, conv1_b = params["conv1_w"], params["conv1_b"]
    conv2_w, conv2_b = params["conv2_w"], params["conv2_b"]
    l1_w, l1_b = params["linear1_w"], params["linear1_b"]
    l2_w, l2_b = params["linear2_w"], params["linear2_b"]

    B, N = x.shape
    C1 = conv1_w.shape[0]
    C2 = conv2_w.shape[0]

    min_value = jnp.min(x, axis=1)                                     # (B,)
    w1 = conv1_w.reshape(C1)
    w2 = conv2_w.reshape(C2, C1)
    y1 = x[:, None, :] * w1[None, :, None] + conv1_b[None, :, None]    # (B,C1,N)
    y2 = jnp.einsum("ck,bkn->bcn", w2, y1) + conv2_b[None, :, None]    # (B,C2,N)
    flat = y2.reshape(B, C2 * N)
    feat = jnp.concatenate([flat, min_value[:, None]], axis=1)         # (B, C2*N+1)
    h = feat @ l1_w.T + l1_b
    h = jnp.where(h > 0, h, 0.01 * h)                                  # LeakyReLU
    y = h @ l2_w.T + l2_b
    return jnp.maximum(y, 0.0)                                         # ReLU


if __name__ == "__main__":
    # module hyperparameters (input_channels must be 1 given x.unsqueeze(1) in forward)
    B, N = 8, 16          # batch, input_features
    C1, C2, L = 8, 4, 32  # conv_filters_1, conv_filters_2, linear_features

    key = jax.random.PRNGKey(0)
    ks = jax.random.split(key, 9)
    params = {
        "conv1_w": jax.random.uniform(ks[0], (C1, 1, 1), jnp.float32, -1.0, 1.0),
        "conv1_b": jax.random.uniform(ks[1], (C1,), jnp.float32, -1.0, 1.0),
        "conv2_w": jax.random.uniform(ks[2], (C2, C1, 1), jnp.float32, -0.35, 0.35),
        "conv2_b": jax.random.uniform(ks[3], (C2,), jnp.float32, -0.35, 0.35),
        "linear1_w": jax.random.uniform(ks[4], (L, C2 * N + 1), jnp.float32, -0.12, 0.12),
        "linear1_b": jax.random.uniform(ks[5], (L,), jnp.float32, -0.12, 0.12),
        "linear2_w": jax.random.uniform(ks[6], (1, L), jnp.float32, -0.17, 0.17),
        "linear2_b": jax.random.uniform(ks[7], (1,), jnp.float32, -0.17, 0.17),
    }
    x = jax.random.normal(ks[8], (B, N), jnp.float32)

    out = approx_net_intensity_pallas(x, params)
    out = jax.block_until_ready(out)

    ref = reference_forward(x, params)
    assert out.shape == (B, 1)
    assert jnp.allclose(out, ref, rtol=1e-4, atol=1e-5), (out, ref)

    print("KERNEL_OK")
</pallas_src>

<mosaic_0001>
module attributes {stable_mosaic.version = 11 : i64} {
  func.func @_approx_net_kernel(%arg0: i32, %arg1: memref<128x16xf32, #tpu.memory_space<vmem>>, %arg2: memref<32x17xf32, #tpu.memory_space<vmem>>, %arg3: memref<32x2xf32, #tpu.memory_space<vmem>>, %arg4: memref<1x1xf32, #tpu.memory_space<smem>>, %arg5: memref<1x128xf32, #tpu.memory_space<vmem>>) attributes {dimension_semantics = [#tpu.dimension_semantics<parallel>], iteration_bounds = array<i64: 1>, scalar_prefetch = 0 : i64, scratch_operands = 0 : i64, tpu.core_type = #tpu.core_type<tc>, window_params = [{transform_indices = @transform_0, window_bounds = array<i64: 128, 16>}, {pipeline_mode = #tpu.pipeline_mode<synchronous>, transform_indices = @transform_1, window_bounds = array<i64: 32, 17>}, {pipeline_mode = #tpu.pipeline_mode<synchronous>, transform_indices = @transform_2, window_bounds = array<i64: 32, 2>}, {transform_indices = @transform_3, window_bounds = array<i64: 1, 1>}, {transform_indices = @transform_4, window_bounds = array<i64: 1, 128>}]} {
    %c0 = arith.constant 0 : index
    %c0_0 = arith.constant 0 : index
    %0 = vector.load %arg1[%c0, %c0_0] : memref<128x16xf32, #tpu.memory_space<vmem>>, vector<128x16xf32>
    %cst = arith.constant dense<0x7F800000> : vector<128xf32>
    %1 = vector.multi_reduction <minimumf>, %0, %cst [1] : vector<128x16xf32> to vector<128xf32>
    %2 = vector.shape_cast %1 : vector<128xf32> to vector<128x1xf32>
    %3 = tpu.concatenate %0, %2 in 1 : vector<128x16xf32>, vector<128x1xf32> -> vector<128x17xf32>
    %c0_1 = arith.constant 0 : index
    %c0_2 = arith.constant 0 : index
    %4 = vector.load %arg2[%c0_1, %c0_2] : memref<32x17xf32, #tpu.memory_space<vmem>>, vector<32x17xf32>
    %cst_3 = arith.constant dense<0.000000e+00> : vector<32x128xf32>
    %5 = tpu.matmul %4, %3, %cst_3 {dimension_numbers = #tpu.dot_dimension_numbers<[1], [1], [0], [0], [0, 0, 1, 0], [], []>} : vector<32x17xf32>, vector<128x17xf32>, vector<32x128xf32> -> vector<32x128xf32>
    %c0_4 = arith.constant 0 : index
    %c0_5 = arith.constant 0 : index
    %6 = vector.load %arg3[%c0_4, %c0_5] : memref<32x2xf32, #tpu.memory_space<vmem>>, vector<32x1xf32>
    %7 = vector.broadcast %6 : vector<32x1xf32> to vector<32x128xf32>
    %8 = arith.addf %5, %7 : vector<32x128xf32>
    %cst_6 = arith.constant 0.00999999977 : f32
    %9 = vector.broadcast %cst_6 : f32 to vector<32x128xf32>
    %10 = arith.mulf %9, %8 : vector<32x128xf32>
    %11 = arith.maximumf %8, %10 : vector<32x128xf32>
    %c0_7 = arith.constant 0 : index
    %c1 = arith.constant 1 : index
    %12 = vector.load %arg3[%c0_7, %c1] : memref<32x2xf32, #tpu.memory_space<vmem>>, vector<32x1xf32>
    %13 = vector.broadcast %12 : vector<32x1xf32> to vector<32x128xf32>
    %14 = arith.mulf %11, %13 : vector<32x128xf32>
    %cst_8 = arith.constant dense<0.000000e+00> : vector<128xf32>
    %15 = vector.multi_reduction <add>, %14, %cst_8 [0] : vector<32x128xf32> to vector<128xf32>
    %16 = vector.shape_cast %15 : vector<128xf32> to vector<1x128xf32>
    %c0_9 = arith.constant 0 : index
    %c0_10 = arith.constant 0 : index
    %17 = memref.load %arg4[%c0_9, %c0_10] : memref<1x1xf32, #tpu.memory_space<smem>>
    %18 = vector.broadcast %17 : f32 to vector<1x128xf32>
    %19 = arith.addf %16, %18 : vector<1x128xf32>
    %cst_11 = arith.constant 0.000000e+00 : f32
    %20 = vector.broadcast %cst_11 : f32 to vector<1x128xf32>
    %21 = arith.maximumf %19, %20 : vector<1x128xf32>
    %c0_12 = arith.constant 0 : index
    %c0_13 = arith.constant 0 : index
    %22 = vector.load %arg5[%c0_12, %c0_13] : memref<1x128xf32, #tpu.memory_space<vmem>>, vector<1x128xf32>
    tpu.vector_store %arg5[%c0_12, %c0_13], %21 {strides = array<i32>} : memref<1x128xf32, #tpu.memory_space<vmem>>, vector<1x128xf32>,
    return
  }
  func.func @transform_0(%arg0: i32) -> (i32, i32) {
    %c0_i32 = arith.constant 0 : i32
    %c0_i32_0 = arith.constant 0 : i32
    return %arg0, %c0_i32 : i32, i32
  }
  func.func @transform_1(%arg0: i32) -> (i32, i32) {
    %c0_i32 = arith.constant 0 : i32
    %c0_i32_0 = arith.constant 0 : i32
    %c0_i32_1 = arith.constant 0 : i32
    return %c0_i32, %c0_i32_0 : i32, i32
  }
  func.func @transform_2(%arg0: i32) -> (i32, i32) {
    %c0_i32 = arith.constant 0 : i32
    %c0_i32_0 = arith.constant 0 : i32
    %c0_i32_1 = arith.constant 0 : i32
    return %c0_i32, %c0_i32_0 : i32, i32
  }
  func.func @transform_3(%arg0: i32) -> (i32, i32) {
    %c0_i32 = arith.constant 0 : i32
    %c0_i32_0 = arith.constant 0 : i32
    %c0_i32_1 = arith.constant 0 : i32
    return %c0_i32, %c0_i32_0 : i32, i32
  }
  func.func @transform_4(%arg0: i32) -> (i32, i32) {
    %c0_i32 = arith.constant 0 : i32
    %c0_i32_0 = arith.constant 0 : i32
    return %c0_i32, %arg0 : i32, i32
  }
}

</mosaic_0001>

<bundles_post_ra>
// kernel: _call_kernel.1
= control target key start
LH: loop header
LB: loop body
LE: loop exit
PB: predicated region body
PF: predicated region fallthrough
CT: control target
= control target key end

     0   :  { %vm34_vm0 = vcmask 130048   ;;  %vm127_vm1 = vcmask 138240   ;;  %v435_v34 = vmov 0   ;;  %v436_v39 = vmov 1   ;;  %s704_s0 = inlined_call_operand.vmem [shape: f32[128,16], index: 0, kind: input, shape index: {}]   ;;  %s705_s1 = inlined_call_operand.vmem [shape: f32[32,17], index: 1, kind: input, shape index: {}]   ;;  %s706_s2 = inlined_call_operand.vmem [shape: f32[32,2], index: 2, kind: input, shape index: {}]   ;;  %s707_s3 = inlined_call_operand.<no memory space> [shape: f32[1,1], index: 3, kind: input, shape index: {}]   ;;  %s708_s4 = inlined_call_operand.vmem [shape: f32[1,128], index: 4, kind: output, shape index: {}]  }
   0x1   :  { %v465_v0 = vld [vmem:[%s704_s0 + $0x78] sm:$0xff]  ;;  %v470_v1 = vld [vmem:[%s704_s0 + $0x70] sm:$0xff]  ;;  %v475_v2 = vld [vmem:[%s704_s0 + $0x68] sm:$0xff]  ;;  %432 = vset.pattern.permute.xlu1 %v435_v34  ;;  %431 = vset.pattern.permute.xlu0 %v435_v34 }
   0x2   :  { %v80_v3 = vsel %vm34_vm0, %v465_v0, inf  ;;  %v74_v4 = vsel %vm34_vm0, %v475_v2, inf  ;;  %v484_v5 = vld [vmem:[%s704_s0 + $0x60] sm:$0xff]  ;;  %v77_v6 = vsel %vm34_vm0, %v470_v1, inf  ;;  %v493_v8 = vld [vmem:[%s704_s0 + $0x58] sm:$0xff]  ;;  %v498_v9 = vld [vmem:[%s704_s0 + $0x50] sm:$0xff] }
   0x3   :  { %81 = vmin.xlane.f32.xlu0 %v80_v3  ;;  %75 = vmin.xlane.f32.xlu1 %v74_v4  ;;  %v71_v7 = vsel %vm34_vm0, %v484_v5, inf  ;;  %v68_v10 = vsel %vm34_vm0, %v493_v8, inf  ;;  %v65_v11 = vsel %vm34_vm0, %v498_v9, inf  ;;  %v507_v12 = vld [vmem:[%s704_s0 + $0x48] sm:$0xff]  ;;  %v512_v13 = vld [vmem:[%s704_s0 + $0x40] sm:$0xff]  ;;  %v521_v16 = vld [vmem:[%s704_s0 + $0x38] sm:$0xff] }
   0x4   :  { %v62_v14 = vsel %vm34_vm0, %v507_v12, inf  ;;  %v59_v15 = vsel %vm34_vm0, %v512_v13, inf  ;;  %v526_v17 = vld [vmem:[%s704_s0 + $0x30] sm:$0xff]  ;;  %v56_v18 = vsel %vm34_vm0, %v521_v16, inf  ;;  %v535_v20 = vld [vmem:[%s704_s0 + $0x28] sm:$0xff]  ;;  %v540_v21 = vld [vmem:[%s704_s0 + $0x20] sm:$0xff] }
   0x5   :  { %v53_v19 = vsel %vm34_vm0, %v526_v17, inf  ;;  %v50_v22 = vsel %vm34_vm0, %v535_v20, inf  ;;  %v47_v23 = vsel %vm34_vm0, %v540_v21, inf  ;;  %v549_v24 = vld [vmem:[%s704_s0 + $0x18] sm:$0xff]  ;;  %v554_v25 = vld [vmem:[%s704_s0 + $0x10] sm:$0xff]  ;;  %v563_v28 = vld [vmem:[%s704_s0 + $0x8] sm:$0xff] }
   0x6   :  { %v44_v26 = vsel %vm34_vm0, %v549_v24, inf  ;;  %v41_v27 = vsel %vm34_vm0, %v554_v25, inf  ;;  %v568_v29 = vld [vmem:[%s704_s0] sm:$0xff]  ;;  %v38_v30 = vsel %vm34_vm0, %v563_v28, inf  ;;  %v101_v33 = vld [vmem:[%s705_s1 + $0x10] sm:$0xff]  ;;  %v104_v35 = vld [vmem:[%s706_s2 + $0x8] sm:$0xff] }
   0x7   :  { %78 = vmin.xlane.f32.xlu0 %v77_v6  ;;  %72 = vmin.xlane.f32.xlu1 %v71_v7  ;;  %v35_v31 = vsel %vm34_vm0, %v568_v29, inf  ;;  %v99_v32 = vld [vmem:[%s705_s1] sm:$0xff]  ;;  %v105_v37 = vld [vmem:[%s706_s2 + $0x10] sm:$0xff]  ;;  %v106_v38 = vld [vmem:[%s706_s2 + $0x18] sm:$0xff] }
   0x8   :  { %391 = vmatprep.mubr.msk.f32.mxu0 %vm127_vm1, %v99_v32  ;;  %394 = vmatprep.mubr.msk.f32.mxu1 %vm127_vm1, %v101_v33  ;;  %v103_v36 = vld [vmem:[%s706_s2] sm:$0xff] }
   0xb   :  { %69 = vmin.xlane.f32.xlu0 %v68_v10  ;;  %66 = vmin.xlane.f32.xlu1 %v65_v11 }
   0xf   :  { %63 = vmin.xlane.f32.xlu0 %v62_v14  ;;  %60 = vmin.xlane.f32.xlu1 %v59_v15 }
  0x13   :  { %57 = vmin.xlane.f32.xlu0 %v56_v18  ;;  %54 = vmin.xlane.f32.xlu1 %v53_v19 }
  0x17   :  { %51 = vmin.xlane.f32.xlu0 %v50_v22  ;;  %48 = vmin.xlane.f32.xlu1 %v47_v23 }
  0x1b   :  { %45 = vmin.xlane.f32.xlu0 %v44_v26  ;;  %42 = vmin.xlane.f32.xlu1 %v41_v27 }
  0x1f   :  { %39 = vmin.xlane.f32.xlu0 %v38_v30  ;;  %36 = vmin.xlane.f32.xlu1 %v35_v31 }
  0x30   :  { %114 = vperm.xlu1 %432, %v104_v35  }
  0x34   :  { %119 = vperm.xlu1 %432, %v105_v37  }
  0x35   :  { %109 = vperm.xlu0 %431, %v103_v36  }
  0x38   :  { %124 = vperm.xlu1 %432, %v106_v38  }
  0x39   :  { %434 = vset.pattern.permute.xlu0 %v436_v39 }
  0x3c   :  { %433 = vset.pattern.permute.xlu1 %v436_v39 }
  0x3d   :  { %282 = vperm.xlu1 %433, %v103_v36  }
  0x41   :  { %286 = vperm.xlu1 %433, %v104_v35  }
  0x45   :  { %290 = vperm.xlu1 %433, %v105_v37  }
  0x49   :  { %294 = vperm.xlu1 %433, %v106_v38  }
  0x8c   :  { %v82_v40 = vpop.xlane.xlu0 %81  ;;  %v76_v41 = vpop.xlane.xlu1 %75 }
  0x8d   :  { %v98_v42 = vsel %vm34_vm0, %v465_v0, %v82_v40  ;;  %v96_v45 = vsel %vm34_vm0, %v475_v2, %v76_v41 }
  0x8e   :  { %359 = vmatprep.subr.msk.mxu0 %vm127_vm1, %v98_v42  ;;  %397 = vmatprep.subr.msk.mxu1 %vm127_vm1, %v98_v42 }
  0x8f   :  { %360 = vmatpush3.xpose.msk.msra.mxu0 %vm127_vm1, %v98_v42  ;;  %413 = vmatpush3.xpose.msk.msra.mxu1 %vm127_vm1, %v98_v42 }
  0x90   :  { %v79_v43 = vpop.xlane.xlu0 %78  ;;  %v73_v46 = vpop.xlane.xlu1 %72 }
  0x91   :  { %v97_v44 = vsel %vm34_vm0, %v470_v1, %v79_v43  ;;  %v95_v47 = vsel %vm34_vm0, %v484_v5, %v73_v46  ;;  %v311_v46 = vstv %s707_s3 }
  0x92   :  { %361 = vmatprep.subr.msk.mxu0 %vm127_vm1, %v97_v44  ;;  %398 = vmatprep.subr.msk.mxu1 %vm127_vm1, %v97_v44 }
  0x93   :  { %362 = vmatpush3.xpose.msk.msra.mxu0 %vm127_vm1, %v97_v44  ;;  %414 = vmatpush3.xpose.msk.msra.mxu1 %vm127_vm1, %v97_v44 }
  0x94   :  { %363 = vmatprep.subr.msk.mxu0 %vm127_vm1, %v96_v45  ;;  %399 = vmatprep.subr.msk.mxu1 %vm127_vm1, %v96_v45  ;;  %v70_v48 = vpop.xlane.xlu0 %69  ;;  %v67_v50 = vpop.xlane.xlu1 %66 }
  0x95   :  { %v94_v49 = vsel %vm34_vm0, %v493_v8, %v70_v48  ;;  %v93_v51 = vsel %vm34_vm0, %v498_v9, %v67_v50  ;;  %v100_v8 = vld [vmem:[%s705_s1 + $0x8] sm:$0xff]  ;;  %v102_v9 = vld [vmem:[%s705_s1 + $0x18] sm:$0xff] }
  0x97   :  { %364 = vmatpush3.xpose.msk.msra.mxu0 %vm127_vm1, %v96_v45  ;;  %415 = vmatpush3.xpose.msk.msra.mxu1 %vm127_vm1, %v96_v45 }
  0x98   :  { %365 = vmatprep.subr.msk.mxu0 %vm127_vm1, %v95_v47  ;;  %400 = vmatprep.subr.msk.mxu1 %vm127_vm1, %v95_v47  ;;  %v64_v52 = vpop.xlane.xlu0 %63  ;;  %v61_v54 = vpop.xlane.xlu1 %60 }
  0x99   :  { %v92_v53 = vsel %vm34_vm0, %v507_v12, %v64_v52  ;;  %v91_v55 = vsel %vm34_vm0, %v512_v13, %v61_v54 }
  0x9b   :  { %366 = vmatpush3.xpose.msk.msra.mxu0 %vm127_vm1, %v95_v47  ;;  %416 = vmatpush3.xpose.msk.msra.mxu1 %vm127_vm1, %v95_v47 }
  0x9c   :  { %367 = vmatprep.subr.msk.mxu0 %vm127_vm1, %v94_v49  ;;  %401 = vmatprep.subr.msk.mxu1 %vm127_vm1, %v94_v49  ;;  %v58_v56 = vpop.xlane.xlu0 %57  ;;  %v55_v58 = vpop.xlane.xlu1 %54 }
  0x9d   :  { %v90_v57 = vsel %vm34_vm0, %v521_v16, %v58_v56  ;;  %v89_v59 = vsel %vm34_vm0, %v526_v17, %v55_v58 }
  0x9f   :  { %368 = vmatpush3.xpose.msk.msra.mxu0 %vm127_vm1, %v94_v49  ;;  %417 = vmatpush3.xpose.msk.msra.mxu1 %vm127_vm1, %v94_v49 }
  0xa0   :  { %369 = vmatprep.subr.msk.mxu0 %vm127_vm1, %v93_v51  ;;  %402 = vmatprep.subr.msk.mxu1 %vm127_vm1, %v93_v51  ;;  %v52_v60 = vpop.xlane.xlu0 %51  ;;  %v49_v62 = vpop.xlane.xlu1 %48 }
  0xa1   :  { %v88_v61 = vsel %vm34_vm0, %v535_v20, %v52_v60  ;;  %v87_v63 = vsel %vm34_vm0, %v540_v21, %v49_v62 }
  0xa3   :  { %370 = vmatpush3.xpose.msk.msra.mxu0 %vm127_vm1, %v93_v51  ;;  %418 = vmatpush3.xpose.msk.msra.mxu1 %vm127_vm1, %v93_v51 }
  0xa4   :  { %371 = vmatprep.subr.msk.mxu0 %vm127_vm1, %v92_v53  ;;  %403 = vmatprep.subr.msk.mxu1 %vm127_vm1, %v92_v53  ;;  %v46_v0 = vpop.xlane.xlu0 %45  ;;  %v43_v2 = vpop.xlane.xlu1 %42 }
  0xa5   :  { %v86_v1 = vsel %vm34_vm0, %v549_v24, %v46_v0  ;;  %v85_v3 = vsel %vm34_vm0, %v554_v25, %v43_v2 }
  0xa7   :  { %372 = vmatpush3.xpose.msk.msra.mxu0 %vm127_vm1, %v92_v53  ;;  %419 = vmatpush3.xpose.msk.msra.mxu1 %vm127_vm1, %v92_v53 }
  0xa8   :  { %373 = vmatprep.subr.msk.mxu0 %vm127_vm1, %v91_v55  ;;  %404 = vmatprep.subr.msk.mxu1 %vm127_vm1, %v91_v55  ;;  %v40_v4 = vpop.xlane.xlu0 %39  ;;  %v37_v6 = vpop.xlane.xlu1 %36 }
  0xa9   :  { %v84_v5 = vsel %vm34_vm0, %v563_v28, %v40_v4  ;;  %v83_v7 = vsel %vm34_vm0, %v568_v29, %v37_v6 }
  0xab   :  { %374 = vmatpush3.xpose.msk.msra.mxu0 %vm127_vm1, %v91_v55  ;;  %420 = vmatpush3.xpose.msk.msra.mxu1 %vm127_vm1, %v91_v55 }
  0xac   :  { %375 = vmatprep.subr.msk.mxu0 %vm127_vm1, %v90_v57  ;;  %405 = vmatprep.subr.msk.mxu1 %vm127_vm1, %v90_v57  ;;  %v115_v10 = vpop.permute.xlu1 %114 }
  0xaf   :  { %376 = vmatpush3.xpose.msk.msra.mxu0 %vm127_vm1, %v90_v57  ;;  %421 = vmatpush3.xpose.msk.msra.mxu1 %vm127_vm1, %v90_v57 }
  0xb0   :  { %377 = vmatprep.subr.msk.mxu0 %vm127_vm1, %v89_v59  ;;  %406 = vmatprep.subr.msk.mxu1 %vm127_vm1, %v89_v59  ;;  %v120_v11 = vpop.permute.xlu1 %119  ;;  %v110_v15 = vpop.permute.xlu0 %109 }
  0xb3   :  { %378 = vmatpush3.xpose.msk.msra.mxu0 %vm127_vm1, %v89_v59  ;;  %422 = vmatpush3.xpose.msk.msra.mxu1 %vm127_vm1, %v89_v59 }
  0xb4   :  { %379 = vmatprep.subr.msk.mxu0 %vm127_vm1, %v88_v61  ;;  %407 = vmatprep.subr.msk.mxu1 %vm127_vm1, %v88_v61  ;;  %v125_v12 = vpop.permute.xlu1 %124 }
  0xb7   :  { %380 = vmatpush3.xpose.msk.msra.mxu0 %vm127_vm1, %v88_v61  ;;  %423 = vmatpush3.xpose.msk.msra.mxu1 %vm127_vm1, %v88_v61 }
  0xb8   :  { %381 = vmatprep.subr.msk.mxu0 %vm127_vm1, %v87_v63  ;;  %408 = vmatprep.subr.msk.mxu1 %vm127_vm1, %v87_v63  ;;  %v283_v13 = vpop.permute.xlu1 %282 }
  0xbb   :  { %382 = vmatpush3.xpose.msk.msra.mxu0 %vm127_vm1, %v87_v63  ;;  %424 = vmatpush3.xpose.msk.msra.mxu1 %vm127_vm1, %v87_v63 }
  0xbc   :  { %383 = vmatprep.subr.msk.mxu0 %vm127_vm1, %v86_v1  ;;  %409 = vmatprep.subr.msk.mxu1 %vm127_vm1, %v86_v1  ;;  %v287_v14 = vpop.permute.xlu1 %286 }
  0xbf   :  { %384 = vmatpush3.xpose.msk.msra.mxu0 %vm127_vm1, %v86_v1  ;;  %425 = vmatpush3.xpose.msk.msra.mxu1 %vm127_vm1, %v86_v1 }
  0xc0   :  { %385 = vmatprep.subr.msk.mxu0 %vm127_vm1, %v85_v3  ;;  %410 = vmatprep.subr.msk.mxu1 %vm127_vm1, %v85_v3  ;;  %v291_v29 = vpop.permute.xlu1 %290 }
  0xc3   :  { %386 = vmatpush3.xpose.msk.msra.mxu0 %vm127_vm1, %v85_v3  ;;  %426 = vmatpush3.xpose.msk.msra.mxu1 %vm127_vm1, %v85_v3 }
  0xc4   :  { %387 = vmatprep.subr.msk.mxu0 %vm127_vm1, %v84_v5  ;;  %411 = vmatprep.subr.msk.mxu1 %vm127_vm1, %v84_v5  ;;  %v295_v37 = vpop.permute.xlu1 %294 }
  0xc7   :  { %388 = vmatpush3.xpose.msk.msra.mxu0 %vm127_vm1, %v84_v5  ;;  %427 = vmatpush3.xpose.msk.msra.mxu1 %vm127_vm1, %v84_v5 }
  0xc8   :  { %389 = vmatprep.subr.msk.mxu0 %vm127_vm1, %v83_v7  ;;  %412 = vmatprep.subr.msk.mxu1 %vm127_vm1, %v83_v7 }
  0xcb   :  { %390 = vmatpush3.xpose.msk.msra.mxu0 %vm127_vm1, %v83_v7  ;;  %428 = vmatpush3.xpose.msk.msra.mxu1 %vm127_vm1, %v83_v7 }
  0xce   :  { %392 = vmatmul.mubr.msk.f32.vlgmr.msra.gmra.mxu0 %vm127_vm1, %v100_v8  ;;  %395 = vmatmul.mubr.msk.f32.vlgmr.msra.gmra.mxu1 %vm127_vm1, %v102_v9 }
 0x18e   :  { %v393_v16 = vpop.f32.mrf.mxu0  ;;  %v396_v17 = vpop.f32.mrf.mxu1 }
 0x18f   :  { %v260_v18 = vadd.f32 %v393_v16, %v115_v10  ;;  %v270_v19 = vadd.f32 %v396_v17, %v125_v12 }
 0x190   :  { %v254_v20 = vpop.f32.mrf.mxu0  ;;  %v264_v21 = vpop.f32.mrf.mxu1 }
 0x191   :  { %v274_v22 = vmul.f32 0.01, %v260_v18  ;;  %v255_v23 = vadd.f32 %v254_v20, %v110_v15  ;;  %v265_v24 = vadd.f32 %v264_v21, %v120_v11  ;;  %v276_v26 = vmul.f32 0.01, %v270_v19 }
 0x193   :  { %v278_v25 = vmax.f32 %v260_v18, %v274_v22  ;;  %v273_v27 = vmul.f32 0.01, %v255_v23  ;;  %v275_v28 = vmul.f32 0.01, %v265_v24  ;;  %v280_v33 = vmax.f32 %v270_v19, %v276_v26 }
 0x195   :  { %v277_v30 = vmax.f32 %v255_v23, %v273_v27  ;;  %v279_v31 = vmax.f32 %v265_v24, %v275_v28  ;;  %v298_v32 = vmul.f32 %v287_v14, %v278_v25  ;;  %v300_v38 = vmul.f32 %v295_v37, %v280_v33 }
 0x197   :  { %v297_v34 = vmul.f32 %v283_v13, %v277_v30  ;;  %v299_v36 = vmul.f32 %v291_v29, %v279_v31 }
 0x199   :  { %v301_v35 = vadd.f32 %v298_v32, %v297_v34 }
 0x19b   :  { %v302_v39 = vadd.f32 %v301_v35, %v299_v36 }
 0x19d   :  { %v303_v40 = vadd.f32 %v302_v39, %v300_v38 }
 0x19f   :  { %v304_v41 = vrot.slane %v303_v40, 4 }
 0x1a1   :  { %v305_v42 = vadd.f32 %v304_v41, %v303_v40 }
 0x1a3   :  { %v306_v43 = vrot.slane %v305_v42, 2 }
 0x1a5   :  { %v307_v44 = vadd.f32 %v306_v43, %v305_v42 }
 0x1a7   :  { %v308_v45 = vrot.slane %v307_v44, 1 }
 0x1a9   :  { %v309_v47 = vadd.f32 %v308_v45, %v307_v44 }
 0x1ab   :  { %v312_v48 = vadd.f32 %v311_v46, %v309_v47 }
 0x1ad   :  { %v313_v49 = vmax.f32 %v312_v48, 0.0 }
 0x1af   :  { %314 = vst [vmem:[%s708_s4] sm:$0x1] %v313_v49 }

</bundles_post_ra>
